<compile_context>
chip_gen: v6e
topology: v6e:2x2x1
jax: 0.10.0
libtpu: 0.0.40
codegen_flags: <defaults>
</compile_context>

<pallas_src>
import functools

import jax
import jax.numpy as jnp
from jax.experimental import pallas as pl
from jax.experimental.pallas import tpu as pltpu


# ----------------------------- fused CSE kernel -----------------------------
def _cse_kernel(x_ref, w1t_ref, b1_ref, w2t_ref, b2_ref, o_ref, *, inv_hw):
    # x_ref / o_ref: (Nb, C, HWp) slab holding Nb whole batch elements.
    x = x_ref[...].astype(jnp.float32)                       # (Nb, C, HWp)

    # Global average pool over spatial (lane reduction).  Padded lanes are zero, so
    # dividing by the *true* HW gives the exact mean.
    pooled = jnp.sum(x, axis=-1) * inv_hw                    # (Nb, C)  lane-dense rows

    # SE MLP with a real M dimension (Nb rows):
    #   z1 = pooled @ W1^T + b1 ; relu ; z2 = z1 @ W2^T + b2
    z1 = jnp.dot(pooled, w1t_ref[...], preferred_element_type=jnp.float32) + b1_ref[...]
    z1 = jnp.maximum(z1, 0.0)                                # (Nb, Cr)
    z2 = jnp.dot(z1, w2t_ref[...], preferred_element_type=jnp.float32) + b2_ref[...]

    gate = jax.nn.sigmoid(z2)                                # (Nb, C)

    # Channel-wise rescale: gate broadcast along the lane (spatial) axis.
    o_ref[...] = (x * gate[:, :, None]).astype(o_ref.dtype)


# ----------------------------- block-size heuristic ---------------------------
def _pick_batch_block(n, per_elem_bytes, target_bytes=4 << 20):
    """Largest divisor of n whose block fits the target, preferring >=2 grid steps."""
    divisors = [d for d in range(1, n + 1) if n % d == 0]
    fitting = [d for d in divisors if d * per_elem_bytes <= target_bytes] or [1]
    if n >= 2:
        multi_step = [d for d in fitting if (n // d) >= 2]   # keep both TCs busy (v7x)
        if multi_step:
            fitting = multi_step
    return max(fitting)


# ----------------------------- wrapper ----------------------------------------
def cse_forward(x, w1, b1, w2, b2):
    """Channel SE block.

    x : (N, C, H, W)
    w1: (C//r, C)   b1: (C//r,)     -- nn.Linear(in_ch, in_ch // r)
    w2: (C, C//r)   b2: (C,)        -- nn.Linear(in_ch // r, in_ch)
    returns (N, C, H, W), dtype of x.
    """
    N, C, H, W = x.shape
    Cr = w1.shape[0]
    HW = H * W

    # Free reshape to (N, C, HW); pad the lane axis up to a multiple of 128 so stores
    # stay unmasked (guardrail — no-op for HW=256).
    HWp = ((HW + 127) // 128) * 128
    x3 = x.reshape(N, C, HW)
    if HWp != HW:
        x3 = jnp.pad(x3, ((0, 0), (0, 0), (0, HWp - HW)))

    per_elem_bytes = C * HWp * x.dtype.itemsize
    Nb = _pick_batch_block(N, per_elem_bytes)
    grid_n = N // Nb
    block_bytes = Nb * per_elem_bytes
    # 2x double-buffered (input + output) blocks + weights + headroom; blocks are
    # capped at ~4 MiB so this stays well inside v7x's 64 MiB physical VMEM.
    vmem_limit = int(min(64 << 20, max(32 << 20, 4 * block_bytes + (4 << 20))))

    # PyTorch weights are (out, in); feed transposed so the MLP is row-major matmuls.
    w1t = w1.T.astype(jnp.float32)                 # (C, Cr)
    w2t = w2.T.astype(jnp.float32)                 # (Cr, C)
    b1r = b1.reshape(1, Cr).astype(jnp.float32)    # lane-dense bias rows
    b2r = b2.reshape(1, C).astype(jnp.float32)

    out = pl.pallas_call(
        functools.partial(_cse_kernel, inv_hw=1.0 / HW),
        out_shape=jax.ShapeDtypeStruct((N, C, HWp), x.dtype),
        grid_spec=pltpu.PrefetchScalarGridSpec(
            num_scalar_prefetch=0,
            grid=(grid_n,),
            in_specs=[
                # Nb whole batch elements per block.
                pl.BlockSpec((Nb, C, HWp), lambda n: (n, 0, 0)),
                # Weights / biases: full arrays, same block every step.
                pl.BlockSpec((C, Cr), lambda n: (0, 0)),
                pl.BlockSpec((1, Cr), lambda n: (0, 0)),
                pl.BlockSpec((Cr, C), lambda n: (0, 0)),
                pl.BlockSpec((1, C), lambda n: (0, 0)),
            ],
            out_specs=pl.BlockSpec((Nb, C, HWp), lambda n: (n, 0, 0)),
        ),
        compiler_params=pltpu.CompilerParams(
            dimension_semantics=("parallel",),     # batch blocks are independent
            vmem_limit_bytes=vmem_limit,
        ),
    )(x3, w1t, b1r, w2t, b2r)

    if HWp != HW:
        out = out[..., :HW]
    return out.reshape(N, C, H, W)


# ----------------------------- pure-JAX reference ----------------------------
def cse_reference(x, w1, b1, w2, b2):
    pooled = x.reshape(*x.shape[:-2], -1).mean(-1)        # (N, C)
    h = jnp.maximum(pooled @ w1.T + b1, 0.0)              # (N, C//r)
    g = jax.nn.sigmoid(h @ w2.T + b2)                     # (N, C)
    return x * g[:, :, None, None]


# ----------------------------- main ------------------------------------------
if __name__ == "__main__":
    fwd = jax.jit(cse_forward)

    def run_case(seed, N, C, H, W, r):
        key = jax.random.PRNGKey(seed)
        kx, k1, k2, k3, k4 = jax.random.split(key, 5)
        Cr = C // r
        x = jax.random.normal(kx, (N, C, H, W), jnp.float32)
        w1 = jax.random.normal(k1, (Cr, C), jnp.float32) * 0.1
        b1 = jax.random.normal(k2, (Cr,), jnp.float32) * 0.1
        w2 = jax.random.normal(k3, (C, Cr), jnp.float32) * 0.1
        b2 = jax.random.normal(k4, (C,), jnp.float32) * 0.1

        out = fwd(x, w1, b1, w2, b2)
        jax.block_until_ready(out)

        ref = cse_reference(x, w1, b1, w2, b2)
        assert out.shape == (N, C, H, W), out.shape
        assert out.dtype == x.dtype
        max_err = float(jnp.max(jnp.abs(out - ref)))
        assert max_err < 2e-5, f"mismatch vs reference ({N},{C},{H},{W}): {max_err}"

    # Config A: module defaults (in_ch=64, r=8), 16x16 spatial, batch=2.
    run_case(0, N=2, C=64, H=16, W=16, r=8)
    # Config B: exercises batch folding (Nb>1) and the HW-padding guardrail (HW=64).
    run_case(0, N=8, C=32, H=8, W=8, r=4)

    print("KERNEL_OK")
</pallas_src>

<mosaic_0001>
module attributes {stable_mosaic.version = 11 : i64} {
  func.func @_cse_kernel(%arg0: i32, %arg1: memref<1x64x256xf32, #tpu.memory_space<vmem>>, %arg2: memref<64x8xf32, #tpu.memory_space<vmem>>, %arg3: memref<1x8xf32, #tpu.memory_space<vmem>>, %arg4: memref<8x64xf32, #tpu.memory_space<vmem>>, %arg5: memref<1x64xf32, #tpu.memory_space<vmem>>, %arg6: memref<1x64x256xf32, #tpu.memory_space<vmem>>) attributes {dimension_semantics = [#tpu.dimension_semantics<parallel>], iteration_bounds = array<i64: 2>, scalar_prefetch = 0 : i64, scratch_operands = 0 : i64, tpu.core_type = #tpu.core_type<tc>, window_params = [{transform_indices = @transform_0, window_bounds = array<i64: 1, 64, 256>}, {pipeline_mode = #tpu.pipeline_mode<synchronous>, transform_indices = @transform_1, window_bounds = array<i64: 64, 8>}, {pipeline_mode = #tpu.pipeline_mode<synchronous>, transform_indices = @transform_2, window_bounds = array<i64: 1, 8>}, {pipeline_mode = #tpu.pipeline_mode<synchronous>, transform_indices = @transform_3, window_bounds = array<i64: 8, 64>}, {pipeline_mode = #tpu.pipeline_mode<synchronous>, transform_indices = @transform_4, window_bounds = array<i64: 1, 64>}, {transform_indices = @transform_5, window_bounds = array<i64: 1, 64, 256>}]} {
    %c0 = arith.constant 0 : index
    %c0_0 = arith.constant 0 : index
    %c0_1 = arith.constant 0 : index
    %0 = vector.load %arg1[%c0, %c0_0, %c0_1] : memref<1x64x256xf32, #tpu.memory_space<vmem>>, vector<1x64x256xf32>
    %cst = arith.constant dense<0.000000e+00> : vector<1x64xf32>
    %1 = vector.multi_reduction <add>, %0, %cst [2] : vector<1x64x256xf32> to vector<1x64xf32>
    %cst_2 = arith.constant 3.906250e-03 : f32
    %2 = vector.broadcast %cst_2 : f32 to vector<1x64xf32>
    %3 = arith.mulf %1, %2 : vector<1x64xf32>
    %c0_3 = arith.constant 0 : index
    %c0_4 = arith.constant 0 : index
    %4 = vector.load %arg2[%c0_3, %c0_4] : memref<64x8xf32, #tpu.memory_space<vmem>>, vector<64x8xf32>
    %cst_5 = arith.constant dense<0.000000e+00> : vector<1x8xf32>
    %5 = tpu.matmul %3, %4, %cst_5 {dimension_numbers = #tpu.dot_dimension_numbers<[1], [0], [0], [1], [0, 0, 1, 1], [], []>} : vector<1x64xf32>, vector<64x8xf32>, vector<1x8xf32> -> vector<1x8xf32>
    %c0_6 = arith.constant 0 : index
    %c0_7 = arith.constant 0 : index
    %6 = vector.load %arg3[%c0_6, %c0_7] : memref<1x8xf32, #tpu.memory_space<vmem>>, vector<1x8xf32>
    %7 = arith.addf %5, %6 : vector<1x8xf32>
    %cst_8 = arith.constant 0.000000e+00 : f32
    %8 = vector.broadcast %cst_8 : f32 to vector<1x8xf32>
    %9 = arith.maximumf %7, %8 : vector<1x8xf32>
    %c0_9 = arith.constant 0 : index
    %c0_10 = arith.constant 0 : index
    %10 = vector.load %arg4[%c0_9, %c0_10] : memref<8x64xf32, #tpu.memory_space<vmem>>, vector<8x64xf32>
    %cst_11 = arith.constant dense<0.000000e+00> : vector<1x64xf32>
    %11 = tpu.matmul %9, %10, %cst_11 {dimension_numbers = #tpu.dot_dimension_numbers<[1], [0], [0], [1], [0, 0, 1, 1], [], []>} : vector<1x8xf32>, vector<8x64xf32>, vector<1x64xf32> -> vector<1x64xf32>
    %c0_12 = arith.constant 0 : index
    %c0_13 = arith.constant 0 : index
    %12 = vector.load %arg5[%c0_12, %c0_13] : memref<1x64xf32, #tpu.memory_space<vmem>>, vector<1x64xf32>
    %13 = arith.addf %11, %12 : vector<1x64xf32>
    %14 = arith.negf %13 : vector<1x64xf32>
    %15 = math.exp %14 : vector<1x64xf32>
    %cst_14 = arith.constant 1.000000e+00 : f32
    %16 = vector.broadcast %cst_14 : f32 to vector<1x64xf32>
    %17 = arith.addf %16, %15 : vector<1x64xf32>
    %18 = arith.divf %16, %17 : vector<1x64xf32>
    %19 = vector.shape_cast %18 : vector<1x64xf32> to vector<1x64x1xf32>
    %20 = vector.broadcast %19 : vector<1x64x1xf32> to vector<1x64x256xf32>
    %21 = arith.mulf %0, %20 : vector<1x64x256xf32>
    %c0_15 = arith.constant 0 : index
    %c0_16 = arith.constant 0 : index
    %c0_17 = arith.constant 0 : index
    %22 = vector.load %arg6[%c0_15, %c0_16, %c0_17] : memref<1x64x256xf32, #tpu.memory_space<vmem>>, vector<1x64x256xf32>
    tpu.vector_store %arg6[%c0_15, %c0_16, %c0_17], %21 {strides = array<i32>} : memref<1x64x256xf32, #tpu.memory_space<vmem>>, vector<1x64x256xf32>,
    return
  }
  func.func @transform_0(%arg0: i32) -> (i32, i32, i32) {
    %c0_i32 = arith.constant 0 : i32
    %c0_i32_0 = arith.constant 0 : i32
    %c0_i32_1 = arith.constant 0 : i32
    return %arg0, %c0_i32, %c0_i32_0 : i32, i32, i32
  }
  func.func @transform_1(%arg0: i32) -> (i32, i32) {
    %c0_i32 = arith.constant 0 : i32
    %c0_i32_0 = arith.constant 0 : i32
    %c0_i32_1 = arith.constant 0 : i32
    return %c0_i32, %c0_i32_0 : i32, i32
  }
  func.func @transform_2(%arg0: i32) -> (i32, i32) {
    %c0_i32 = arith.constant 0 : i32
    %c0_i32_0 = arith.constant 0 : i32
    %c0_i32_1 = arith.constant 0 : i32
    return %c0_i32, %c0_i32_0 : i32, i32
  }
  func.func @transform_3(%arg0: i32) -> (i32, i32) {
    %c0_i32 = arith.constant 0 : i32
    %c0_i32_0 = arith.constant 0 : i32
    %c0_i32_1 = arith.constant 0 : i32
    return %c0_i32, %c0_i32_0 : i32, i32
  }
  func.func @transform_4(%arg0: i32) -> (i32, i32) {
    %c0_i32 = arith.constant 0 : i32
    %c0_i32_0 = arith.constant 0 : i32
    %c0_i32_1 = arith.constant 0 : i32
    return %c0_i32, %c0_i32_0 : i32, i32
  }
  func.func @transform_5(%arg0: i32) -> (i32, i32, i32) {
    %c0_i32 = arith.constant 0 : i32
    %c0_i32_0 = arith.constant 0 : i32
    %c0_i32_1 = arith.constant 0 : i32
    return %arg0, %c0_i32, %c0_i32_0 : i32, i32, i32
  }
}

</mosaic_0001>

<bundles_post_ra>
// kernel: cse_forward.1
= control target key start
LH: loop header
LB: loop body
LE: loop exit
PB: predicated region body
PF: predicated region fallthrough
CT: control target
= control target key end

     0   :  { %s728_s18 = smov 0   ;;  %s879_s0 = inlined_call_operand.vmem [shape: f32[2,64,256], index: 0, kind: input, shape index: {}]   ;;  %s880_s1 = inlined_call_operand.vmem [shape: f32[64,8], index: 1, kind: input, shape index: {}]   ;;  %s881_s2 = inlined_call_operand.vmem [shape: f32[1,8], index: 2, kind: input, shape index: {}]   ;;  %s882_s3 = inlined_call_operand.vmem [shape: f32[8,64], index: 3, kind: input, shape index: {}]   ;;  %s883_s4 = inlined_call_operand.vmem [shape: f32[1,64], index: 4, kind: input, shape index: {}]   ;;  %s884_s5 = inlined_call_operand.vmem [shape: f32[2,64,256], index: 5, kind: output, shape index: {}]  }
   0x1 LB: > { %s623_s19 = sadd.s32 4294967295, %s694_s18   ;;  %p627_p0 = scmp.ge.s32.totalorder %s694_s18, 1  ;;  %s694_s18 = sphi %s728_s18, %s15_s18  }
   0x2   : > { %p187_p1 = scmp.lt.s32.totalorder %s694_s18, 3 }
   0x4   : > { %p188_p2 = pnand %p627_p0, %p187_p1 }
   0x5   : > { %p215_p3 = scmp.lt.s32.totalorder (!%p188_p2), %s623_s19, 1 }
   0x6   : > { %191 = sbr.rel (%p188_p2) target bundleno = 733 (0x2dd), region = 40 }
   0xb   : > { %s886_s19 = smov (!%p215_p3, %s623_s19), 1  ;;  %v696_v24 = vmov 0.0   ;;  %v280_v25 = vld [vmem:[%s880_s1 + $0x38] sm:$0xff]  ;;  %v279_v26 = vld [vmem:[%s880_s1 + $0x30] sm:$0xff]  ;;  %v278_v27 = vld [vmem:[%s880_s1 + $0x28] sm:$0xff]  ;;  %vm697_vm0 = vmmov 0   ;;  %v290_v33 = vlaneseq }
   0xc   : > { %s637_s20 = sshll.u32 %s886_s19, 7  ;;  %650 = vmatprep.subr.mxu0 %v696_v24  ;;  %669 = vmatprep.subr.mxu1 %v696_v24  ;;  %v277_v28 = vld [vmem:[%s880_s1 + $0x20] sm:$0xff]  ;;  %v276_v29 = vld [vmem:[%s880_s1 + $0x18] sm:$0xff]  ;;  %v275_v30 = vld [vmem:[%s880_s1 + $0x10] sm:$0xff]  ;;  %vm301_vm1 = vcmask 130112   ;;  %vm308_vm2 = vcmask 195712  }
   0xd   : > { %s219_s23 = scalar_lea.vmem %s879_s0, %s637_s20  ;;  %651 = vmatpush3.msra.mxu0 %v280_v25  ;;  %v274_v31 = vld [vmem:[%s880_s1 + $0x8] sm:$0xff]  ;;  %v273_v32 = vld [vmem:[%s880_s1] sm:$0xff]  ;;  %666 = vmatprep.mubr.msk.f32.mxu0 %vm697_vm0, %v696_v24  ;;  %v291_v34 = vand.u32 127, %v290_v33  ;;  %v816_v35 = vshrl.u32 %v290_v33, 7  ;;  %vm315_vm3 = vcmask 261312   ;;  %vm322_vm4 = vcmask 326912   ;;  %s842_s26 = scalar_lea.vmem %s884_s5, %s637_s20 }
   0xe   : > { %v744_v0 = vld [vmem:[%s219_s23] sm:$0xff]  ;;  %v746_v1 = vld [vmem:[%s219_s23 + $0x8] sm:$0xff]  ;;  %v754_v5 = vld [vmem:[%s219_s23 + $0x10] sm:$0xff]  ;;  %652 = vmatprep.subr.mxu0 %v696_v24  ;;  %671 = vmatprep.mubr.msk.f32.mxu1 %vm697_vm0, %v696_v24  ;;  %vm329_vm5 = vcmask 392512   ;;  %vm336_vm6 = vcmask 458112   ;;  %vm343_vm7 = vcmask 523712  }
   0xf   : > { %v748_v2 = vld [vmem:[%s219_s23 + $0x20] sm:$0xff]  ;;  %v241_v3 = vadd.f32 %v746_v1, %v744_v0  ;;  %v752_v4 = vld [vmem:[%s219_s23 + $0x28] sm:$0xff]  ;;  %v756_v6 = vld [vmem:[%s219_s23 + $0x18] sm:$0xff]  ;;  %653 = vmatpush3.msra.mxu0 %v279_v26  ;;  %v296_v36 = vadd.s32 4294967288, %v291_v34  ;;  %v303_v38 = vadd.s32 4294967280, %v291_v34  ;;  %v310_v39 = vadd.s32 4294967272, %v291_v34 }
  0x10   : > { %v247_v7 = vadd.f32 %v752_v4, %v748_v2  ;;  %v760_v8 = vld [vmem:[%s219_s23 + $0x30] sm:$0xff]  ;;  %v762_v9 = vld [vmem:[%s219_s23 + $0x38] sm:$0xff]  ;;  %v244_v10 = vadd.f32 %v756_v6, %v754_v5  ;;  %v768_v12 = vld [vmem:[%s219_s23 + $0x40] sm:$0xff]  ;;  %654 = vmatprep.subr.mxu0 %v696_v24  ;;  %v294_v41 = vsub.s32 %v291_v34, %v816_v35  ;;  %v317_v44 = vadd.s32 4294967264, %v291_v34 }
  0x11   : > { %242 = vadd.xlane.f32.xlu0 %v241_v3  ;;  %v250_v11 = vadd.f32 %v762_v9, %v760_v8  ;;  %v770_v13 = vld [vmem:[%s219_s23 + $0x48] sm:$0xff]  ;;  %v772_v14 = vld [vmem:[%s219_s23 + $0x50] sm:$0xff]  ;;  %v774_v15 = vld [vmem:[%s219_s23 + $0x58] sm:$0xff]  ;;  %655 = vmatpush3.msra.mxu0 %v278_v27  ;;  %v299_v43 = vsub.s32 %v296_v36, %v816_v35  ;;  %v306_v45 = vsub.s32 %v303_v38, %v816_v35  ;;  %v324_v49 = vadd.s32 4294967256, %v291_v34 }
  0x12   : > { %248 = vadd.xlane.f32.xlu1 %v247_v7  ;;  %v253_v16 = vadd.f32 %v770_v13, %v768_v12  ;;  %v256_v17 = vadd.f32 %v774_v15, %v772_v14  ;;  %v780_v18 = vld [vmem:[%s219_s23 + $0x60] sm:$0xff]  ;;  %v782_v19 = vld [vmem:[%s219_s23 + $0x68] sm:$0xff]  ;;  %v784_v20 = vld [vmem:[%s219_s23 + $0x70] sm:$0xff]  ;;  %656 = vmatprep.subr.mxu0 %v696_v24  ;;  %v313_v48 = vsub.s32 %v310_v39, %v816_v35  ;;  %v331_v56 = vadd.s32 4294967248, %v291_v34 }
  0x13   : > { %v786_v21 = vld [vmem:[%s219_s23 + $0x78] sm:$0xff]  ;;  %v259_v22 = vadd.f32 %v782_v19, %v780_v18  ;;  %657 = vmatpush3.msra.mxu0 %v277_v28  ;;  %v320_v55 = vsub.s32 %v317_v44, %v816_v35  ;;  %v327_v60 = vsub.s32 %v324_v49, %v816_v35  ;;  %v338_v61 = vadd.s32 4294967240, %v291_v34  ;;  %v419_v34 = vld [vmem:[%s882_s3] sm:$0xff] }
  0x14   : > { %v262_v23 = vadd.f32 %v786_v21, %v784_v20  ;;  %658 = vmatprep.subr.mxu0 %v696_v24  ;;  %vm345_vm8 = vcmask 523264   ;;  %670 = vmatpush3.msra.mxu1 %v419_v34  ;;  %v281_v36 = vld [vmem:[%s881_s2] sm:$0x1]  ;;  %vm421_vm9 = vcmask 64512  }
  0x15   : > { %245 = vadd.xlane.f32.xlu0 %v244_v10  ;;  %659 = vmatpush3.msra.mxu0 %v276_v29 }
  0x16   : > { %251 = vadd.xlane.f32.xlu1 %v250_v11  ;;  %660 = vmatprep.subr.mxu0 %v696_v24 }
  0x17   : > { %661 = vmatpush3.msra.mxu0 %v275_v30 }
  0x18   : > { %662 = vmatprep.subr.mxu0 %v696_v24 }
  0x19   : > { %254 = vadd.xlane.f32.xlu0 %v253_v16  ;;  %663 = vmatpush3.msra.mxu0 %v274_v31 }
  0x1a   : > { %257 = vadd.xlane.f32.xlu1 %v256_v17  ;;  %664 = vmatprep.subr.mxu0 %v696_v24  ;;  %v334_v17 = vsub.s32 %v331_v56, %v816_v35  ;;  %v341_v24 = vsub.s32 %v338_v61, %v816_v35 }
  0x1b   : > { %665 = vmatpush3.msra.mxu0 %v273_v32 }
  0x1d   : > { %260 = vadd.xlane.f32.xlu0 %v259_v22 }
  0x1e   : > { %263 = vadd.xlane.f32.xlu1 %v262_v23 }
  0x9a   : > { %v243_v37 = vpop.xlane.xlu0 %242 }
  0x9b   : > { %v249_v40 = vpop.xlane.xlu1 %248  ;;  %v265_v42 = vmul.f32 0.00390625, %v243_v37 }
  0x9c   : > { %v267_v46 = vmul.f32 0.00390625, %v249_v40 }
  0x9d   : > { %v295_v53 = vrot.slane %v265_v42, %v294_v41  ;;  %v420_v41 = vld [vmem:[%s883_s4] sm:$0x1] }
  0x9e   : > { %v246_v47 = vpop.xlane.xlu0 %245  ;;  %v307_v57 = vrot.slane %v267_v46, %v306_v45 }
  0x9f   : > { %v266_v50 = vmul.f32 0.00390625, %v246_v47  ;;  %v252_v51 = vpop.xlane.xlu1 %251 }
  0xa0   : > { %v268_v52 = vmul.f32 0.00390625, %v252_v51 }
  0xa1   : > { %v300_v54 = vrot.slane %v266_v50, %v299_v43 }
  0xa2   : > { %v314_v58 = vrot.slane %v268_v52, %v313_v48  ;;  %v255_v59 = vpop.xlane.xlu0 %254  ;;  %v503_v48 = vsub.s32 0, %v816_v35 }
  0xa3   : > { %v302_v62 = vsel %vm301_vm1, %v300_v54, %v295_v53  ;;  %v269_v63 = vmul.f32 0.00390625, %v255_v59  ;;  %v258_v3 = vpop.xlane.xlu1 %257 }
  0xa4   : > { %v309_v7 = vsel %vm308_vm2, %v307_v57, %v302_v62  ;;  %v270_v10 = vmul.f32 0.00390625, %v258_v3 }
  0xa5   : > { %v316_v11 = vsel %vm315_vm3, %v314_v58, %v309_v7  ;;  %v321_v16 = vrot.slane %v269_v63, %v320_v55 }
  0xa6   : > { %v328_v22 = vrot.slane %v270_v10, %v327_v60  ;;  %v261_v23 = vpop.xlane.xlu0 %260 }
  0xa7   : > { %v323_v25 = vsel %vm322_vm4, %v321_v16, %v316_v11  ;;  %v271_v26 = vmul.f32 0.00390625, %v261_v23  ;;  %v264_v27 = vpop.xlane.xlu1 %263 }
  0xa8   : > { %v272_v28 = vmul.f32 0.00390625, %v264_v27  ;;  %v330_v30 = vsel %vm329_vm5, %v328_v22, %v323_v25 }
  0xa9   : > { %v335_v29 = vrot.slane %v271_v26, %v334_v17 }
  0xaa   : > { %v342_v31 = vrot.slane %v272_v28, %v341_v24 }
  0xab   : > { %v337_v32 = vsel %vm336_vm6, %v335_v29, %v330_v30 }
  0xac   : > { %v344_v33 = vsel %vm343_vm7, %v342_v31, %v337_v32 }
  0xad   : > { %667 = vmatmul.mubr.msk.f32.vlgmr.msra.gmra.mxu0 %vm345_vm8, %v344_v33 }
 0x16d   : > { %v414_v37 = vpop.f32.mrf.mxu0 }
 0x16e   : > { %v415_v38 = vadd.f32 %v414_v37, %v281_v36 }
 0x16f   : > { %v668_v39 = vpop.f32.mrf.mxu0 }
 0x170   : > { %v418_v40 = vmax.f32 %v415_v38, 0.0 }
 0x172   : > { %672 = vmatmul.mubr.msk.f32.vlgmr.msra.gmra.mxu1 %vm421_vm9, %v418_v40 }
 0x232   : > { %v491_v42 = vpop.f32.mrf.mxu1 }
 0x233   : > { %v492_v43 = vadd.f32 %v491_v42, %v420_v41 }
 0x234   : > { %v673_v44 = vpop.f32.mrf.mxu1 }
 0x235   : > { %v634_v45 = vmul.f32 -1.442695, %v492_v43 }
 0x237   : > { %684 = vpow2.f32 %v634_v45 }
 0x244   : > { %v685_v46 = vpop.eup %684 }
 0x245   : > { %v498_v47 = vadd.f32 1.0, %v685_v46 }
 0x247   : > { %686 = vrcp.f32 %v498_v47 }
 0x254   : > { %v687_v49 = vpop.eup %686 }
 0x255   : > { %v504_v50 = vrot.slane %v687_v49, %v503_v48 }
 0x257   : > { %510 = vbcast.lane.b32.xlu1 %v504_v50, 264  ;;  %506 = vbcast.lane.b32.xlu0 %v504_v50, 256 }
 0x25b   : > { %514 = vbcast.lane.b32.xlu1 %v504_v50, 272  ;;  %522 = vbcast.lane.b32.xlu0 %v504_v50, 288 }
 0x25f   : > { %518 = vbcast.lane.b32.xlu1 %v504_v50, 280  ;;  %530 = vbcast.lane.b32.xlu0 %v504_v50, 304 }
 0x263   : > { %526 = vbcast.lane.b32.xlu1 %v504_v50, 296 }
 0x267   : > { %534 = vbcast.lane.b32.xlu1 %v504_v50, 312 }
 0x2c9   : > { %v511_v35 = vpop.permute.xlu1 %510  ;;  %v507_v51 = vpop.permute.xlu0 %506 }
 0x2ca   : > { %v538_v52 = vmul.f32 %v511_v35, %v754_v5  ;;  %v539_v53 = vmul.f32 %v511_v35, %v756_v6  ;;  %v536_v54 = vmul.f32 %v507_v51, %v744_v0  ;;  %v537_v55 = vmul.f32 %v507_v51, %v746_v1 }
 0x2cc   : > { %554 = vst [vmem:[%s842_s26 + $0x10] sm:$0xff] %v538_v52  ;;  %555 = vst [vmem:[%s842_s26 + $0x18] sm:$0xff] %v539_v53 }
 0x2cd   : > { %552 = vst [vmem:[%s842_s26] sm:$0xff] %v536_v54  ;;  %553 = vst [vmem:[%s842_s26 + $0x8] sm:$0xff] %v537_v55  ;;  %v515_v56 = vpop.permute.xlu1 %514  ;;  %v523_v57 = vpop.permute.xlu0 %522 }
 0x2ce   : > { %v540_v58 = vmul.f32 %v515_v56, %v748_v2  ;;  %v541_v5 = vmul.f32 %v515_v56, %v752_v4  ;;  %v544_v6 = vmul.f32 %v523_v57, %v768_v12  ;;  %v545_v0 = vmul.f32 %v523_v57, %v770_v13 }
 0x2d0   : > { %556 = vst [vmem:[%s842_s26 + $0x20] sm:$0xff] %v540_v58  ;;  %557 = vst [vmem:[%s842_s26 + $0x28] sm:$0xff] %v541_v5 }
 0x2d1   : > { %560 = vst [vmem:[%s842_s26 + $0x40] sm:$0xff] %v544_v6  ;;  %561 = vst [vmem:[%s842_s26 + $0x48] sm:$0xff] %v545_v0  ;;  %v519_v1 = vpop.permute.xlu1 %518  ;;  %v531_v59 = vpop.permute.xlu0 %530 }
 0x2d2   : > { %v542_v60 = vmul.f32 %v519_v1, %v760_v8  ;;  %v543_v2 = vmul.f32 %v519_v1, %v762_v9  ;;  %v548_v4 = vmul.f32 %v531_v59, %v780_v18  ;;  %v549_v12 = vmul.f32 %v531_v59, %v782_v19 }
 0x2d4   : > { %558 = vst [vmem:[%s842_s26 + $0x30] sm:$0xff] %v542_v60  ;;  %559 = vst [vmem:[%s842_s26 + $0x38] sm:$0xff] %v543_v2 }
 0x2d5   : > { %564 = vst [vmem:[%s842_s26 + $0x60] sm:$0xff] %v548_v4  ;;  %565 = vst [vmem:[%s842_s26 + $0x68] sm:$0xff] %v549_v12  ;;  %v527_v13 = vpop.permute.xlu1 %526 }
 0x2d6   : > { %v546_v61 = vmul.f32 %v527_v13, %v772_v14  ;;  %v547_v62 = vmul.f32 %v527_v13, %v774_v15 }
 0x2d8   : > { %562 = vst [vmem:[%s842_s26 + $0x50] sm:$0xff] %v546_v61  ;;  %563 = vst [vmem:[%s842_s26 + $0x58] sm:$0xff] %v547_v62 }
 0x2d9   : > { %v535_v8 = vpop.permute.xlu1 %534 }
 0x2da   : > { %v550_v63 = vmul.f32 %v535_v8, %v784_v20  ;;  %v551_v9 = vmul.f32 %v535_v8, %v786_v21 }
 0x2dc   : > { %566 = vst [vmem:[%s842_s26 + $0x70] sm:$0xff] %v550_v63  ;;  %567 = vst [vmem:[%s842_s26 + $0x78] sm:$0xff] %v551_v9 }
 0x2dd PF: > { %s15_s18 = sadd.s32 1, %s694_s18  }
 0x2de   : > { %p12_p4 = scmp.ge.s32.totalorder %s15_s18, 4  }
 0x2e0   :  { %14 = sbr.rel (!%p12_p4) target bundleno = 1 (0x1), region = 70 }

</bundles_post_ra>
